<compile_context>
chip_gen: v7x
topology: tpu7x:2x2x1
jax: 0.10.0
libtpu: 0.0.40
codegen_flags: <defaults>
</compile_context>

<pallas_src>
import functools

import numpy as np
import jax
import jax.numpy as jnp
from jax.experimental import pallas as pl
from jax.experimental.pallas import tpu as pltpu


MATMUL_DTYPE = jnp.bfloat16            # MXU-native on v5e/v6e/v7x; accumulation stays f32
_SQRT_HALF = 0.7071067811865476


def _default_vmem_limit():
    """Scoped-VMEM budget: ~3/4 of physical (capped at 96 MiB) -> ~96 MiB on v5e/v6e
    (128 MiB physical), ~48 MiB on v7x (64 MiB physical).  Safe static fallback."""
    try:
        cap = pltpu.get_tpu_info().vmem_capacity_bytes
        return int(min(cap * 3 // 4, 96 * 1024 * 1024))
    except Exception:
        return 48 * 1024 * 1024


VMEM_LIMIT = _default_vmem_limit()


def _mxu_dot(a, b):
    return jnp.dot(a.astype(MATMUL_DTYPE), b.astype(MATMUL_DTYPE),
                   preferred_element_type=jnp.float32)


def _erf_approx(z):
    # Abramowitz & Stegun 7.1.26 rational approximation (max abs err ~1.5e-7); matches the
    # exact-erf nn.GELU to float32 precision.  (A tanh-approx GELU would shave ~12 VALU ops
    # per element at ~1e-3 deviation -- kept exact here for semantics.)
    a1, a2, a3, a4, a5 = 0.254829592, -0.284496736, 1.421413741, -1.453152027, 1.061405429
    p = 0.3275911
    sgn = jnp.where(z >= 0.0, 1.0, -1.0)
    az = jnp.abs(z)
    t = 1.0 / (1.0 + p * az)
    poly = ((((a5 * t + a4) * t + a3) * t + a2) * t + a1) * t
    return sgn * (1.0 - poly * jnp.exp(-az * az))


def _gelu_exact(x):
    return 0.5 * x * (1.0 + _erf_approx(x * _SQRT_HALF))


# ----------------------------------------------------------------------------
# Tile / batching choosers
# ----------------------------------------------------------------------------
def _pick_tile(dim, pref, mult):
    """Largest tile <= pref that divides dim (multiple of `mult`), else the full dim."""
    if dim <= pref:
        return dim
    t = (pref // mult) * mult
    while t >= mult:
        if dim % t == 0:
            return t
        t -= mult
    return dim


def _pick_tile_mc(dim, pref, mult, min_steps=2):
    """Like _pick_tile but, when possible, keep >= min_steps grid steps so the v7x megacore
    has something to shard and the auto-pipeline has >= 2 stages."""
    t = _pick_tile(dim, pref, mult)
    if dim // t < min_steps and dim >= min_steps * mult:
        t = _pick_tile(dim, max(mult, dim // min_steps), mult)
    return t


def _pick_batch_per_step(batch, rows_per_image, C, n, vmem_limit):
    """Batch as many images' windows per attention grid step as fit a conservative VMEM row
    budget, while keeping >= 2 grid steps (megacore / pipelining) whenever batch >= 2."""
    # rough f32 bytes per token-row inside the fused attention kernel (x, residual/out,
    # per-head q/k/v/o temps, score/prob rows), x2 for double-buffered in/out blocks.
    bytes_per_row = 4 * (4 * C + 2 * n) * 2
    max_rows = max(rows_per_image, (vmem_limit // 4) // max(bytes_per_row, 1))
    best = 1
    for cand in range(1, batch + 1):
        if batch % cand:
            continue
        if cand * rows_per_image > max_rows:
            continue
        if batch >= 2 and batch // cand < 2:
            continue                       # keep >= 2 grid steps for v7x megacore
        best = cand
    return best


# ----------------------------------------------------------------------------
# Pallas kernels
# ----------------------------------------------------------------------------
def _matmul_kernel(x_ref, w_ref, b_ref, o_ref, acc_ref, *, act):
    """Tiled y = act(x @ w + b); grid = (M/tm, N/tn, K/tk), K (reduction) last."""
    k = pl.program_id(2)

    @pl.when(k == 0)
    def _():
        acc_ref[...] = jnp.zeros_like(acc_ref)

    acc_ref[...] += _mxu_dot(x_ref[...], w_ref[...])

    @pl.when(k == pl.num_programs(2) - 1)
    def _():
        y = acc_ref[...] + b_ref[...]
        if act == "gelu":
            y = _gelu_exact(y)
        elif act == "relu":
            y = jnp.maximum(y, 0.0)
        o_ref[...] = y.astype(o_ref.dtype)


def pallas_linear(x, w, b=None, act=None):
    lead = x.shape[:-1]
    K = x.shape[-1]
    N = w.shape[1]
    x2 = x.reshape(-1, K)
    M = x2.shape[0]
    if b is None:
        b = jnp.zeros((N,), jnp.float32)
    b2 = b.reshape(1, N)

    tm = _pick_tile_mc(M, 512, 8)
    tn = _pick_tile(N, 256, 128)
    tk = _pick_tile(K, 512, 128)
    grid = (M // tm, N // tn, K // tk)

    out = pl.pallas_call(
        functools.partial(_matmul_kernel, act=act),
        out_shape=jax.ShapeDtypeStruct((M, N), jnp.float32),
        grid=grid,
        in_specs=[
            pl.BlockSpec((tm, tk), lambda i, j, k: (i, k)),
            pl.BlockSpec((tk, tn), lambda i, j, k: (k, j)),
            pl.BlockSpec((1, tn), lambda i, j, k: (0, j)),
        ],
        out_specs=pl.BlockSpec((tm, tn), lambda i, j, k: (i, j)),
        scratch_shapes=[pltpu.VMEM((tm, tn), jnp.float32)],
        compiler_params=pltpu.CompilerParams(
            dimension_semantics=("parallel", "parallel", "arbitrary"),
            vmem_limit_bytes=VMEM_LIMIT),
    )(x2, w, b2)
    return out.reshape(lead + (N,))


def _matmul_ln_kernel(*refs, eps, has_res):
    """Tiled out = [res +] LayerNorm(x @ w + b); N kept whole for the LN reduction."""
    if has_res:
        x_ref, w_ref, b_ref, g_ref, beta_ref, res_ref, o_ref, acc_ref = refs
    else:
        x_ref, w_ref, b_ref, g_ref, beta_ref, o_ref, acc_ref = refs
        res_ref = None
    k = pl.program_id(1)

    @pl.when(k == 0)
    def _():
        acc_ref[...] = jnp.zeros_like(acc_ref)

    acc_ref[...] += _mxu_dot(x_ref[...], w_ref[...])

    @pl.when(k == pl.num_programs(1) - 1)
    def _():
        y = acc_ref[...] + b_ref[...]
        mu = jnp.mean(y, axis=-1, keepdims=True)
        yc = y - mu
        var = jnp.mean(yc * yc, axis=-1, keepdims=True)
        y = yc * jax.lax.rsqrt(var + eps) * g_ref[...] + beta_ref[...]
        if has_res:
            y = y + res_ref[...]
        o_ref[...] = y.astype(o_ref.dtype)


def pallas_linear_ln(x, w, b, gamma, beta, residual=None, eps=1e-5):
    lead = x.shape[:-1]
    K = x.shape[-1]
    N = w.shape[1]
    x2 = x.reshape(-1, K)
    M = x2.shape[0]
    if b is None:
        b = jnp.zeros((N,), jnp.float32)
    has_res = residual is not None

    tm = _pick_tile_mc(M, 256, 8)
    tk = _pick_tile(K, 512, 128)
    grid = (M // tm, K // tk)

    in_specs = [
        pl.BlockSpec((tm, tk), lambda i, k: (i, k)),
        pl.BlockSpec((tk, N), lambda i, k: (k, 0)),
        pl.BlockSpec((1, N), lambda i, k: (0, 0)),
        pl.BlockSpec((1, N), lambda i, k: (0, 0)),
        pl.BlockSpec((1, N), lambda i, k: (0, 0)),
    ]
    args = [x2, w, b.reshape(1, N), gamma.reshape(1, N), beta.reshape(1, N)]
    if has_res:
        in_specs.append(pl.BlockSpec((tm, N), lambda i, k: (i, 0)))
        args.append(residual.reshape(-1, N))

    out = pl.pallas_call(
        functools.partial(_matmul_ln_kernel, eps=eps, has_res=has_res),
        out_shape=jax.ShapeDtypeStruct((M, N), jnp.float32),
        grid=grid,
        in_specs=in_specs,
        out_specs=pl.BlockSpec((tm, N), lambda i, k: (i, 0)),
        scratch_shapes=[pltpu.VMEM((tm, N), jnp.float32)],
        compiler_params=pltpu.CompilerParams(
            dimension_semantics=("parallel", "arbitrary"),
            vmem_limit_bytes=VMEM_LIMIT),
    )(*args)
    return out.reshape(lead + (N,))


def _window_block_kernel(x_ref, wq_ref, wk_ref, wv_ref, bq_ref, bv_ref, scale_ref,
                         bias_ref, wproj_ref, bproj_ref, g_ref, beta_ref, o_ref, *,
                         heads, n, n_windows, bpg, eps):
    """Fused: per-head qkv + cosine window attention + softmax + proj + norm1 + residual.

    One grid step processes bpg images worth of windows (bpg * n_windows windows).  Per-head
    weights are pre-split at build time, so every head access is a static leading-axis ref
    index (no lane slices), and head outputs accumulate straight into the output projection
    (no lane concatenate).
    """
    C = x_ref.shape[-1]
    d = C // heads
    w_step = bpg * n_windows
    rows = w_step * n

    x = x_ref[...]                                                       # (rows, C) f32
    xb = x.astype(MATMUL_DTYPE)

    y = jnp.zeros((rows, C), jnp.float32)
    # TODO(synk): with n=16 the score/softmax tensors use only 16 of 128 lanes; packing
    # several windows' keys along the lane axis (block-diagonal scores) would make the
    # VPU/EUP softmax lane-dense.
    for h in range(heads):
        q = jnp.dot(xb, wq_ref[h], preferred_element_type=jnp.float32) + bq_ref[h]
        k = jnp.dot(xb, wk_ref[h], preferred_element_type=jnp.float32)
        v = jnp.dot(xb, wv_ref[h], preferred_element_type=jnp.float32) + bv_ref[h]

        # F.normalize(dim=-1): x / max(||x||, 1e-12) == x * rsqrt(max(||x||^2, 1e-24))
        q = q * jax.lax.rsqrt(jnp.maximum(jnp.sum(q * q, -1, keepdims=True), 1e-24))
        k = k * jax.lax.rsqrt(jnp.maximum(jnp.sum(k * k, -1, keepdims=True), 1e-24))
        q = q * scale_ref[0, h]                                          # cosine temperature

        qw = q.astype(MATMUL_DTYPE).reshape(w_step, n, d)
        kw = k.astype(MATMUL_DTYPE).reshape(w_step, n, d)
        vw = v.astype(MATMUL_DTYPE).reshape(w_step, n, d)

        s = jnp.einsum("wqd,wkd->wqk", qw, kw,
                       preferred_element_type=jnp.float32)               # (w_step, n, n)

        # Precombined CPB + shift-mask bias, (heads, nW, n, n); windows within a grid step
        # are image-major so a broadcast over the bpg axis is exact (no replication copies).
        bias_h = bias_ref[h].astype(jnp.float32)                         # (nW, n, n)
        s = (s.reshape(bpg, n_windows, n, n) + bias_h[None]).reshape(w_step, n, n)

        s = s - jnp.max(s, axis=-1, keepdims=True)
        p = jnp.exp(s)
        p = p / jnp.sum(p, axis=-1, keepdims=True)                       # exact softmax

        o_h = jnp.einsum("wqk,wkd->wqd", p.astype(MATMUL_DTYPE), vw,
                         preferred_element_type=jnp.float32)             # (w_step, n, d)
        # Head output folds straight into the output projection: y += o_h @ Wproj[h*d:(h+1)*d]
        y = y + jnp.dot(o_h.reshape(rows, d).astype(MATMUL_DTYPE), wproj_ref[h],
                        preferred_element_type=jnp.float32)

    y = y + bproj_ref[...]

    # Res-post-norm (norm1) + residual.  LN is per-token, so applying it in window order
    # (and adding the window-ordered shortcut x) is exactly equivalent to the reference
    # shortcut + norm1(window_reverse(...)) after the wrapper un-permutes.
    mu = jnp.mean(y, axis=-1, keepdims=True)
    yc = y - mu
    var = jnp.mean(yc * yc, axis=-1, keepdims=True)
    y = yc * jax.lax.rsqrt(var + eps) * g_ref[...] + beta_ref[...]
    o_ref[...] = (x + y).astype(o_ref.dtype)


def pallas_window_block_attn(xw_flat, blk, heads, n, n_windows, bpg, C):
    rows_total = xw_flat.shape[0]
    rows_step = bpg * n_windows * n
    grid = (rows_total // rows_step,)
    d = C // heads
    kern = functools.partial(_window_block_kernel, heads=heads, n=n,
                             n_windows=n_windows, bpg=bpg, eps=1e-5)
    return pl.pallas_call(
        kern,
        out_shape=jax.ShapeDtypeStruct((rows_total, C), jnp.float32),
        grid=grid,
        in_specs=[
            pl.BlockSpec((rows_step, C), lambda i: (i, 0)),              # window tokens
            pl.BlockSpec((heads, C, d), lambda i: (0, 0, 0)),            # per-head Wq (bf16)
            pl.BlockSpec((heads, C, d), lambda i: (0, 0, 0)),            # per-head Wk (bf16)
            pl.BlockSpec((heads, C, d), lambda i: (0, 0, 0)),            # per-head Wv (bf16)
            pl.BlockSpec((heads, 1, d), lambda i: (0, 0, 0)),            # per-head q bias
            pl.BlockSpec((heads, 1, d), lambda i: (0, 0, 0)),            # per-head v bias
            pl.BlockSpec(memory_space=pltpu.MemorySpace.SMEM),           # per-head temperature
            pl.BlockSpec((heads, n_windows, n, n), lambda i: (0, 0, 0, 0)),  # CPB+mask (bf16)
            pl.BlockSpec((heads, d, C), lambda i: (0, 0, 0)),            # per-head Wproj (bf16)
            pl.BlockSpec((1, C), lambda i: (0, 0)),                      # proj bias
            pl.BlockSpec((1, C), lambda i: (0, 0)),                      # norm1 gamma
            pl.BlockSpec((1, C), lambda i: (0, 0)),                      # norm1 beta
        ],
        out_specs=pl.BlockSpec((rows_step, C), lambda i: (i, 0)),
        compiler_params=pltpu.CompilerParams(
            dimension_semantics=("parallel",),                           # grid >= 2 -> 2 TCs on v7x
            vmem_limit_bytes=VMEM_LIMIT),
    )(xw_flat, blk["wq"], blk["wk"], blk["wv"], blk["bq"], blk["bv"],
      blk["scale"], blk["attn_bias"], blk["wproj"], blk["proj_b"].reshape(1, C),
      blk["norm1_g"].reshape(1, C), blk["norm1_b"].reshape(1, C))


def _ffn_block_kernel(x_ref, w1_ref, b1_ref, w2_ref, b2_ref, g_ref, beta_ref, o_ref, *, eps):
    """Fused FFN: out = x + LayerNorm(GELU(x @ W1 + b1) @ W2 + b2).

    The (tm, 4C) intermediate lives only in VMEM/registers -- no HBM round-trip.
    """
    x = x_ref[...]                                                       # (tm, C); also residual
    h = _mxu_dot(x, w1_ref[...]) + b1_ref[...]                           # (tm, hidden) f32
    h = _gelu_exact(h)
    y = _mxu_dot(h, w2_ref[...]) + b2_ref[...]                           # (tm, C)
    mu = jnp.mean(y, axis=-1, keepdims=True)
    yc = y - mu
    var = jnp.mean(yc * yc, axis=-1, keepdims=True)
    y = yc * jax.lax.rsqrt(var + eps) * g_ref[...] + beta_ref[...]
    o_ref[...] = (x + y).astype(o_ref.dtype)


def pallas_ffn_block(x2, blk):
    # TODO(synk): for large C/hidden this would need K/N tiling with a VMEM accumulator;
    # at these sizes both weight matrices fit whole in VMEM.
    M, C = x2.shape
    hidden = blk["ff_w1"].shape[1]
    tm = _pick_tile_mc(M, 512, 8)
    grid = (M // tm,)
    return pl.pallas_call(
        functools.partial(_ffn_block_kernel, eps=1e-5),
        out_shape=jax.ShapeDtypeStruct((M, C), jnp.float32),
        grid=grid,
        in_specs=[
            pl.BlockSpec((tm, C), lambda i: (i, 0)),
            pl.BlockSpec((C, hidden), lambda i: (0, 0)),
            pl.BlockSpec((1, hidden), lambda i: (0, 0)),
            pl.BlockSpec((hidden, C), lambda i: (0, 0)),
            pl.BlockSpec((1, C), lambda i: (0, 0)),
            pl.BlockSpec((1, C), lambda i: (0, 0)),
            pl.BlockSpec((1, C), lambda i: (0, 0)),
        ],
        out_specs=pl.BlockSpec((tm, C), lambda i: (i, 0)),
        compiler_params=pltpu.CompilerParams(
            dimension_semantics=("parallel",),
            vmem_limit_bytes=VMEM_LIMIT),
    )(x2, blk["ff_w1"], blk["ff_b1"].reshape(1, hidden),
      blk["ff_w2"], blk["ff_b2"].reshape(1, C),
      blk["norm2_g"].reshape(1, C), blk["norm2_b"].reshape(1, C))


def _norm_pool_head_kernel(x_ref, g_ref, b_ref, w_ref, hb_ref, o_ref, *, eps):
    x = x_ref[...].astype(jnp.float32)                                   # (B, N, C)
    mu = jnp.mean(x, axis=-1, keepdims=True)
    xc = x - mu
    var = jnp.mean(xc * xc, axis=-1, keepdims=True)
    y = xc * jax.lax.rsqrt(var + eps) * g_ref[...] + b_ref[...]
    pooled = jnp.mean(y, axis=1)                                         # adaptive avg-pool
    o_ref[...] = (_mxu_dot(pooled, w_ref[...]) + hb_ref[...]).astype(o_ref.dtype)


def pallas_norm_pool_head(x, g, b, w_pad, hb_pad):
    """Fused final LayerNorm + average pool + classifier head.  The head weight is padded to
    a 128-lane output so stores are unmasked; logits are sliced outside."""
    B, N, C = x.shape
    npad = w_pad.shape[1]
    return pl.pallas_call(
        functools.partial(_norm_pool_head_kernel, eps=1e-5),
        out_shape=jax.ShapeDtypeStruct((B, npad), jnp.float32),
        grid=(1,),
        in_specs=[
            pl.BlockSpec((B, N, C), lambda i: (0, 0, 0)),
            pl.BlockSpec((1, 1, C), lambda i: (0, 0, 0)),
            pl.BlockSpec((1, 1, C), lambda i: (0, 0, 0)),
            pl.BlockSpec((C, npad), lambda i: (0, 0)),
            pl.BlockSpec((1, npad), lambda i: (0, 0)),
        ],
        out_specs=pl.BlockSpec((B, npad), lambda i: (0, 0)),
        compiler_params=pltpu.CompilerParams(
            dimension_semantics=("arbitrary",),
            vmem_limit_bytes=VMEM_LIMIT),
    )(x, g.reshape(1, 1, C), b.reshape(1, 1, C), w_pad, hb_pad.reshape(1, npad))


# ----------------------------------------------------------------------------
# JAX glue (pure permutations / reshapes), matching the PyTorch reference exactly
# ----------------------------------------------------------------------------
# TODO(synk): window partition / reverse and the cyclic roll are kept as XLA permutation
# glue; folding them into the attention BlockSpec index_map (grid over (b, win_row,
# win_col) with a shift-offset table) would save ~2 HBM passes per block.
def window_partition(x, ws):
    B, H, W, C = x.shape
    x = x.reshape(B, H // ws, ws, W // ws, ws, C)
    x = jnp.transpose(x, (0, 1, 3, 2, 4, 5))
    return x.reshape(-1, ws, ws, C)


def window_reverse(windows, ws, H, W):
    C = windows.shape[-1]
    B = windows.shape[0] // ((H // ws) * (W // ws))
    x = windows.reshape(B, H // ws, W // ws, ws, ws, C)
    x = jnp.transpose(x, (0, 1, 3, 2, 4, 5))
    return x.reshape(B, H, W, C)


def build_cpb_inputs(wh, ww):
    rel_h = np.arange(-(wh - 1), wh, dtype=np.float32)
    rel_w = np.arange(-(ww - 1), ww, dtype=np.float32)
    tab = np.stack(np.meshgrid(rel_h, rel_w, indexing="ij"), axis=-1)    # (2wh-1, 2ww-1, 2)
    tab[..., 0] /= max(wh - 1, 1)
    tab[..., 1] /= max(ww - 1, 1)
    tab *= 8.0
    tab = np.sign(tab) * np.log2(np.abs(tab) + 1.0) / np.log2(8.0)
    table = tab.reshape(-1, 2).astype(np.float32)

    ch, cw = np.arange(wh), np.arange(ww)
    coords = np.stack(np.meshgrid(ch, cw, indexing="ij")).reshape(2, -1)
    rel = (coords[:, :, None] - coords[:, None, :]).transpose(1, 2, 0).astype(np.int64)
    rel[..., 0] += wh - 1
    rel[..., 1] += ww - 1
    rel[..., 0] *= 2 * ww - 1
    idx = rel.sum(-1)                                                    # (n, n)
    return jnp.asarray(table), np.asarray(idx.astype(np.int32))


def build_attn_mask(H, W, ws, shift):
    img = np.zeros((1, H, W, 1), np.float32)
    slices = (slice(0, -ws), slice(-ws, -shift), slice(-shift, None))
    cnt = 0
    for hs in slices:
        for wsl in slices:
            img[:, hs, wsl, :] = cnt
            cnt += 1
    mw = img.reshape(1, H // ws, ws, W // ws, ws, 1).transpose(0, 1, 3, 2, 4, 5)
    mw = mw.reshape(-1, ws * ws)
    am = mw[:, None, :] - mw[:, :, None]
    return np.where(am != 0, -100.0, 0.0).astype(np.float32)             # (nW, n, n)


# ----------------------------------------------------------------------------
# Forward pass
# ----------------------------------------------------------------------------
def swin_block(x, blk, H, W, heads, ws, shift):
    B, N, C = x.shape
    n = ws * ws
    n_windows = (H // ws) * (W // ws)

    xi = x.reshape(B, H, W, C)
    if shift > 0:
        xi = jnp.roll(xi, shift=(-shift, -shift), axis=(1, 2))
    xw = window_partition(xi, ws).reshape(-1, C)                         # (B*nW*n, C)

    bpg = _pick_batch_per_step(B, n_windows * n, C, n, VMEM_LIMIT)
    # Fused attention + norm1 + residual (shortcut == window-partitioned x).
    aw = pallas_window_block_attn(xw, blk, heads, n, n_windows, bpg, C)

    aw = aw.reshape(-1, ws, ws, C)
    xo = window_reverse(aw, ws, H, W)
    if shift > 0:
        xo = jnp.roll(xo, shift=(shift, shift), axis=(1, 2))
    x = xo.reshape(B, N, C)

    # Fused FFN (Linear + GELU + Linear) + norm2 + residual in one kernel.
    x2 = x.reshape(B * N, C)
    out = pallas_ffn_block(x2, blk)
    return out.reshape(B, N, C)


def patch_merge(x, pp, H, W):
    B, N, C = x.shape
    xi = x.reshape(B, H, W, C)
    x0 = xi[:, 0::2, 0::2, :]
    x1 = xi[:, 1::2, 0::2, :]
    x2 = xi[:, 0::2, 1::2, :]
    x3 = xi[:, 1::2, 1::2, :]
    xc = jnp.concatenate([x0, x1, x2, x3], axis=-1).reshape(B, -1, 4 * C)
    return pallas_linear_ln(xc, pp["red_w"], None, pp["norm_g"], pp["norm_b"])


def swin_forward(x, params, cfg):
    B, Cin, _, _ = x.shape
    p = cfg["patch_size"]
    Hp, Wp = cfg["patch_resolution"]
    # PatchEmbedding: stride-p conv == per-patch matmul on (c, ph, pw)-ordered patch vectors,
    # fused with the patch LayerNorm.
    xp = x.reshape(B, Cin, Hp, p, Wp, p)
    xp = jnp.transpose(xp, (0, 2, 4, 1, 3, 5)).reshape(B, Hp * Wp, Cin * p * p)
    h = pallas_linear_ln(xp, params["patch_w"], params["patch_b"],
                         params["patch_norm_g"], params["patch_norm_b"])

    for li, layer in enumerate(params["layers"]):
        H, W = cfg["resolutions"][li]
        ws = cfg["window_sizes"][li]
        hds = cfg["heads"][li]
        for bi, blk in enumerate(layer["blocks"]):
            h = swin_block(h, blk, H, W, hds, ws, cfg["shifts"][li][bi])
        if layer["merge"] is not None:
            h = patch_merge(h, layer["merge"], H, W)

    # Fused final LayerNorm + average pool + classifier head (output padded to 128 lanes).
    logits = pallas_norm_pool_head(h, params["final_norm_g"], params["final_norm_b"],
                                   params["head_w"], params["head_b"])
    return logits[:, :cfg["num_classes"]]


# ----------------------------------------------------------------------------
# Deterministic synthetic parameters + one-time (build-time) precomputation
# ----------------------------------------------------------------------------
def build_model(key, *, image_size=32, patch_size=4, in_channels=3, num_classes=10,
                embed_dim=32, depths=(2, 2), heads=(2, 4), window_size=4, ff_ratio=4.0):
    keys = iter(jax.random.split(key, 512))

    def nrm(shape, std=0.02):
        return jax.random.normal(next(keys), shape, jnp.float32) * std

    bf16 = jnp.bfloat16
    Hp, Wp = image_size // patch_size, image_size // patch_size
    num_layers = len(depths)
    params = {
        "patch_w": nrm((in_channels * patch_size * patch_size, embed_dim)).astype(bf16),
        "patch_b": jnp.zeros((embed_dim,), jnp.float32),
        "patch_norm_g": jnp.ones((embed_dim,), jnp.float32),
        "patch_norm_b": jnp.zeros((embed_dim,), jnp.float32),
        "layers": [],
    }
    cfg = {"patch_size": patch_size, "patch_resolution": (Hp, Wp), "heads": list(heads),
           "num_classes": num_classes, "resolutions": [], "window_sizes": [], "shifts": []}

    for li in range(num_layers):
        dim = embed_dim * (2 ** li)
        H, W = Hp // (2 ** li), Wp // (2 ** li)
        ws = window_size if min(H, W) > window_size else min(H, W)
        cfg["resolutions"].append((H, W))
        cfg["window_sizes"].append(ws)

        n = ws * ws
        n_windows = (H // ws) * (W // ws)
        cpb_table, rel_idx = build_cpb_inputs(ws, ws)

        hds = heads[li]
        d_h = dim // hds
        hidden = int(dim * ff_ratio)
        shifts, blocks = [], []
        for bi in range(depths[li]):
            shift = 0 if bi % 2 == 0 else window_size // 2
            if min(H, W) <= window_size:
                shift = 0
            shifts.append(shift)

            # --- raw parameters (matching the reference parameterization) -------------
            scale_logit = jnp.log(10.0 * jnp.ones((1, hds), jnp.float32))
            cpb_w1, cpb_b1 = nrm((2, 512)), jnp.zeros((512,), jnp.float32)
            cpb_w2 = nrm((512, hds))
            q_bias = jnp.zeros((dim,), jnp.float32)
            v_bias = jnp.zeros((dim,), jnp.float32)
            qkv_w = nrm((dim, 3 * dim))
            proj_w = nrm((dim, dim))

            # --- build-time precompute (parameter/geometry-only, hoisted from forward) -
            # cosine-attention temperature: exp(clamp(log-scale, max=log(100)))
            scale = jnp.exp(jnp.minimum(scale_logit, float(np.log(1.0 / 0.01))))
            # CPB MLP (Linear(2,512)+ReLU -> Linear(512,heads)) run once through Pallas.
            h1 = pallas_linear(cpb_table, cpb_w1, cpb_b1, act="relu")
            tbl = pallas_linear(h1, cpb_w2, None)                        # (T, heads)
            cpb = tbl[rel_idx.reshape(-1)].reshape(n, n, hds)
            cpb = 16.0 * jax.nn.sigmoid(jnp.transpose(cpb, (2, 0, 1)))   # (heads, n, n)
            if shift > 0:
                mask = jnp.asarray(build_attn_mask(H, W, ws, shift))     # (nW, n, n)
            else:
                mask = jnp.zeros((n_windows, n, n), jnp.float32)
            attn_bias = (cpb[:, None, :, :] + mask[None, :, :, :]).astype(bf16)  # (h,nW,n,n)

            # Pre-split q/k/v/proj weights per head so the kernel never lane-slices.
            def split_in(wcol):                                          # (dim,dim)->(h,dim,d)
                return jnp.transpose(wcol.reshape(dim, hds, d_h), (1, 0, 2)).astype(bf16)

            blocks.append({
                "norm1_g": jnp.ones((dim,), jnp.float32),
                "norm1_b": jnp.zeros((dim,), jnp.float32),
                "norm2_g": jnp.ones((dim,), jnp.float32),
                "norm2_b": jnp.zeros((dim,), jnp.float32),
                "scale": scale,                                          # (1, heads), SMEM
                "attn_bias": attn_bias,                                  # (heads, nW, n, n) bf16
                "wq": split_in(qkv_w[:, :dim]),
                "wk": split_in(qkv_w[:, dim:2 * dim]),
                "wv": split_in(qkv_w[:, 2 * dim:]),
                "bq": q_bias.reshape(hds, 1, d_h),
                "bv": v_bias.reshape(hds, 1, d_h),
                "wproj": proj_w.reshape(hds, d_h, dim).astype(bf16),     # (heads, d, dim)
                "proj_b": jnp.zeros((dim,), jnp.float32),
                "ff_w1": nrm((dim, hidden)).astype(bf16),
                "ff_b1": jnp.zeros((hidden,), jnp.float32),
                "ff_w2": nrm((hidden, dim)).astype(bf16),
                "ff_b2": jnp.zeros((dim,), jnp.float32),
            })
        layer = {"blocks": blocks, "merge": None}
        if li < num_layers - 1:
            layer["merge"] = {"red_w": nrm((4 * dim, 2 * dim)).astype(bf16),
                              "norm_g": jnp.ones((2 * dim,), jnp.float32),
                              "norm_b": jnp.zeros((2 * dim,), jnp.float32)}
        params["layers"].append(layer)
        cfg["shifts"].append(shifts)

    num_features = embed_dim * (2 ** (num_layers - 1))
    params["final_norm_g"] = jnp.ones((num_features,), jnp.float32)
    params["final_norm_b"] = jnp.zeros((num_features,), jnp.float32)
    # Classifier head padded to a 128-lane output (unmasked stores); logits sliced outside.
    ncls_pad = max(128, ((num_classes + 127) // 128) * 128)
    head_w = nrm((num_features, num_classes))
    params["head_w"] = (jnp.zeros((num_features, ncls_pad), jnp.float32)
                        .at[:, :num_classes].set(head_w)).astype(bf16)
    params["head_b"] = jnp.zeros((ncls_pad,), jnp.float32)
    return params, cfg


if __name__ == "__main__":
    key = jax.random.PRNGKey(0)
    pkey, xkey = jax.random.split(key)
    params, cfg = build_model(pkey)
    x = jax.random.normal(xkey, (2, 3, 32, 32), jnp.float32)   # NCHW, like the PyTorch module

    fwd = jax.jit(lambda inp, prm: swin_forward(inp, prm, cfg))
    out = fwd(x, params)
    jax.block_until_ready(out)
    assert out.shape == (2, 10) and out.dtype == jnp.float32
    assert bool(jnp.all(jnp.isfinite(out)))
    print("KERNEL_OK")
</pallas_src>

<mosaic_0001>
module attributes {stable_mosaic.version = 11 : i64} {
  func.func @_matmul_kernel(%arg0: i32, %arg1: i32, %arg2: i32, %arg3: memref<49x2xf32, #tpu.memory_space<vmem>>, %arg4: memref<2x256xf32, #tpu.memory_space<vmem>>, %arg5: memref<1x256xf32, #tpu.memory_space<vmem>>, %arg6: memref<49x256xf32, #tpu.memory_space<vmem>>, %arg7: memref<49x256xf32, #tpu.memory_space<vmem>>) attributes {dimension_semantics = [#tpu.dimension_semantics<parallel>, #tpu.dimension_semantics<parallel>, #tpu.dimension_semantics<arbitrary>], iteration_bounds = array<i64: 1, 2, 1>, scalar_prefetch = 0 : i64, scratch_operands = 1 : i64, tpu.core_type = #tpu.core_type<tc>, window_params = [{transform_indices = @transform_0, window_bounds = array<i64: 49, 2>}, {transform_indices = @transform_1, window_bounds = array<i64: 2, 256>}, {transform_indices = @transform_2, window_bounds = array<i64: 1, 256>}, {transform_indices = @transform_3, window_bounds = array<i64: 49, 256>}]} {
    %c0_i32 = arith.constant 0 : i32
    %0 = arith.cmpi eq, %arg2, %c0_i32 : i32
    %1 = arith.extui %0 : i1 to i32
    %c0_i32_0 = arith.constant 0 : i32
    %2 = arith.cmpi ne, %1, %c0_i32_0 : i32
    scf.if %2 {
      %cst_10 = arith.constant 0.000000e+00 : f32
      %14 = vector.broadcast %cst_10 : f32 to vector<49x256xf32>
      %c0_11 = arith.constant 0 : index
      %c0_12 = arith.constant 0 : index
      %15 = vector.load %arg7[%c0_11, %c0_12] : memref<49x256xf32, #tpu.memory_space<vmem>>, vector<49x256xf32>
      tpu.vector_store %arg7[%c0_11, %c0_12], %14 {strides = array<i32>} : memref<49x256xf32, #tpu.memory_space<vmem>>, vector<49x256xf32>,
    } else {
    }
    %c0 = arith.constant 0 : index
    %c0_1 = arith.constant 0 : index
    %3 = vector.load %arg7[%c0, %c0_1] : memref<49x256xf32, #tpu.memory_space<vmem>>, vector<49x256xf32>
    %c0_2 = arith.constant 0 : index
    %c0_3 = arith.constant 0 : index
    %4 = vector.load %arg3[%c0_2, %c0_3] : memref<49x2xf32, #tpu.memory_space<vmem>>, vector<49x2xf32>
    %c0_4 = arith.constant 0 : index
    %c0_5 = arith.constant 0 : index
    %5 = vector.load %arg4[%c0_4, %c0_5] : memref<2x256xf32, #tpu.memory_space<vmem>>, vector<2x256xf32>
    %6 = arith.truncf %4 : vector<49x2xf32> to vector<49x2xbf16>
    %7 = arith.truncf %5 : vector<2x256xf32> to vector<2x256xbf16>
    %cst = arith.constant dense<0.000000e+00> : vector<49x256xf32>
    %8 = tpu.matmul %6, %7, %cst {dimension_numbers = #tpu.dot_dimension_numbers<[1], [0], [0], [1], [0, 0, 1, 1], [], []>} : vector<49x2xbf16>, vector<2x256xbf16>, vector<49x256xf32> -> vector<49x256xf32>
    %9 = arith.addf %3, %8 : vector<49x256xf32>
    %c0_6 = arith.constant 0 : index
    %c0_7 = arith.constant 0 : index
    %10 = vector.load %arg7[%c0_6, %c0_7] : memref<49x256xf32, #tpu.memory_space<vmem>>, vector<49x256xf32>
    tpu.vector_store %arg7[%c0_6, %c0_7], %9 {strides = array<i32>} : memref<49x256xf32, #tpu.memory_space<vmem>>, vector<49x256xf32>,
    %c0_i32_8 = arith.constant 0 : i32
    %11 = arith.cmpi eq, %arg2, %c0_i32_8 : i32
    %12 = arith.extui %11 : i1 to i32
    %c0_i32_9 = arith.constant 0 : i32
    %13 = arith.cmpi ne, %12, %c0_i32_9 : i32
    scf.if %13 {
      %c0_10 = arith.constant 0 : index
      %c0_11 = arith.constant 0 : index
      %14 = vector.load %arg7[%c0_10, %c0_11] : memref<49x256xf32, #tpu.memory_space<vmem>>, vector<49x256xf32>
      %c0_12 = arith.constant 0 : index
      %c0_13 = arith.constant 0 : index
      %15 = vector.load %arg5[%c0_12, %c0_13] : memref<1x256xf32, #tpu.memory_space<vmem>>, vector<1x256xf32>
      %16 = vector.broadcast %15 : vector<1x256xf32> to vector<49x256xf32>
      %17 = arith.addf %14, %16 : vector<49x256xf32>
      %cst_14 = arith.constant 0.000000e+00 : f32
      %18 = vector.broadcast %cst_14 : f32 to vector<49x256xf32>
      %19 = arith.maximumf %17, %18 : vector<49x256xf32>
      %c0_15 = arith.constant 0 : index
      %c0_16 = arith.constant 0 : index
      %20 = vector.load %arg6[%c0_15, %c0_16] : memref<49x256xf32, #tpu.memory_space<vmem>>, vector<49x256xf32>
      tpu.vector_store %arg6[%c0_15, %c0_16], %19 {strides = array<i32>} : memref<49x256xf32, #tpu.memory_space<vmem>>, vector<49x256xf32>,
    } else {
    }
    return
  }
  func.func @transform_0(%arg0: i32, %arg1: i32, %arg2: i32) -> (i32, i32) {
    %c0_i32 = arith.constant 0 : i32
    return %arg0, %arg2 : i32, i32
  }
  func.func @transform_1(%arg0: i32, %arg1: i32, %arg2: i32) -> (i32, i32) {
    %c0_i32 = arith.constant 0 : i32
    return %arg2, %arg1 : i32, i32
  }
  func.func @transform_2(%arg0: i32, %arg1: i32, %arg2: i32) -> (i32, i32) {
    %c0_i32 = arith.constant 0 : i32
    %c0_i32_0 = arith.constant 0 : i32
    return %c0_i32, %arg1 : i32, i32
  }
  func.func @transform_3(%arg0: i32, %arg1: i32, %arg2: i32) -> (i32, i32) {
    %c0_i32 = arith.constant 0 : i32
    return %arg0, %arg1 : i32, i32
  }
}

</mosaic_0001>

<bundles_post_ra>
// kernel: tpu_custom_call.1
= control target key start
LH: loop header
LB: loop body
LE: loop exit
PB: predicated region body
PF: predicated region fallthrough
CT: control target
= control target key end

     0   :  { %8 = vsyncpa [#allocation4], 0  ;;  %s1004_s0 = inlined_call_operand.vmem [shape: f32[49,2], index: 0, kind: input, shape index: {}]   ;;  %s1005_s1 = inlined_call_operand.vmem [shape: f32[2,512], index: 1, kind: input, shape index: {}]   ;;  %s1006_s2 = inlined_call_operand.vmem [shape: f32[1,512], index: 2, kind: input, shape index: {}]   ;;  %s1007_s3 = inlined_call_operand.hbm [shape: f32[49,512], index: 3, kind: output, shape index: {}]  }
   0x1   :  { %10 = vsyncpa [#allocation4 + $0x1], 0  ;;  %s823_s12 = smov 0   ;;  %s825_s13 = smov 0  }
   0x2   :  { %s827_s14 = smov 0   ;;  %s829_s15 = smov 0  }
   0x3   :  { %s831_s16 = smov 0   ;;  %s833_s17 = smov 0  }
   0x4 LB: > { %s634_s18 = sadd.s32 4294967295, %s795_s17   ;;  %s635_s19 = sadd.s32 4294967294, %s795_s17   ;;  %s795_s17 = sphi %s833_s17, %s16_s17   ;;  %s791_s16 = sphi %s831_s16, %s1014_s16   ;;  %s787_s15 = sphi %s829_s15, %s1013_s15   ;;  %s783_s14 = sphi %s827_s14, %s1012_s14   ;;  %s779_s13 = sphi %s825_s13, %s1011_s13   ;;  %s775_s12 = sphi %s823_s12, %s1010_s12  }
   0x5   : > { %s31_s20 = sadd.s32 1, %s791_s16  ;;  %s126_s21 = sadd.s32 1, %s783_s14 }
   0x6   : > { %p33_p0 = scmp.ge.s32.totalorder %s31_s20, 2  ;;  %p136_p1 = scmp.ne.s32.totalorder %s783_s14, %s779_s13 }
   0x7   : > { %p137_p2 = scmp.eq.s32.totalorder %s634_s18, 1  ;;  %p142_p3 = scmp.ne.s32.totalorder %s779_s13, %s775_s12 }
   0x8   : > { %s1016_s20 = smov (%p33_p0, %s31_s20), 0  ;;  %p143_p5 = scmp.eq.s32.totalorder %s635_s19, 1 }
   0x9   : > { %p863_p4 = por %p137_p2, %p136_p1  ;;  %s122_s23 = ssub.s32 %s791_s16, %s1016_s20 }
   0xa   : > { %p639_p6 = scmp.ge.s32.totalorder %s795_s17, 1  ;;  %p124_p7 = scmp.eq.s32.totalorder %s122_s23, 0 }
   0xb   : > { %p870_p8 = por %p143_p5, %p142_p3  ;;  %p194_p9 = scmp.lt.s32.totalorder %s795_s17, 3 }
   0xc   : > { %s876_s25 = scalar_select %p124_p7, %s783_s14, %s126_s21  }
   0xd   : > { %p195_p10 = pnand %p639_p6, %p194_p9 }
   0xe   : > { %s640_s26 = sshll.u32 (!%p195_p10), %s787_s15, 1  ;;  %v797_v0 = vmov (!%p195_p10), 0   ;;  %v798_v1 = vmov (!%p195_p10), 0.0   ;;  %vm331_vm0 = vcmask (!%p195_p10), 1040384   ;;  %v293_v5 = vld [vmem:[%s1004_s0] sm:$0xff] (!%p195_p10)  ;;  %v294_v6 = vld [vmem:[%s1004_s0 + $0x8] sm:$0xff] (!%p195_p10)  ;;  %v456_v18 = vlaneseq (!%p195_p10) }
   0xf   : > { %198 = sbr.rel (%p195_p10) target bundleno = 285 (0x11d), region = 32  ;;  %p246_p11 = scmp.lt.s32.totalorder (!%p195_p10), %s640_s26, 3  ;;  %370 = vmatprep.mubr.bf16.mxu0 (!%p195_p10), %v797_v0  ;;  %390 = vmatprep.mubr.bf16.mxu1 (!%p195_p10), %v797_v0  ;;  %277 = vst [vmem:[#allocation2 + $0x60] sm:$0x1] (!%p195_p10), %v798_v1  ;;  %278 = vst [vmem:[#allocation2 + $0x68] sm:$0x1] (!%p195_p10), %v798_v1  ;;  %v301_v11 = vpack.c.bf16 (!%p195_p10), %v294_v6, %v293_v5 }
  0x10   : > { %v297_v7 = vld [vmem:[%s1004_s0 + $0x20] sm:$0xff] (!%p195_p10)  ;;  %v298_v8 = vld [vmem:[%s1004_s0 + $0x28] sm:$0xff] (!%p195_p10)  ;;  %vm318_vm1 = vcmask (!%p195_p10), 15360   ;;  %v295_v13 = vld [vmem:[%s1004_s0 + $0x10] sm:$0xff] (!%p195_p10)  ;;  %v457_v19 = vshrl.u32 (!%p195_p10), %v456_v18, 7  ;;  %s231_s5 = sand.u32 (!%p195_p10), 1, %s779_s13  }
  0x11   : > { %v303_v12 = vpack.c.bf16 (!%p195_p10), %v298_v8, %v297_v7  ;;  %v296_v14 = vld [vmem:[%s1004_s0 + $0x18] sm:$0xff] (!%p195_p10)  ;;  %v299_v15 = vld [vmem:[%s1004_s0 + $0x30] sm:$0x1] (!%p195_p10)  ;;  %s656_s6 = smul.u32 (!%p195_p10), 112, %s231_s5  ;;  %s653_s7 = sshll.u32 (!%p195_p10), %s787_s15, 8 }
  0x12   : > { %v302_v16 = vpack.c.bf16 (!%p195_p10), %v296_v14, %v295_v13  ;;  %v304_v17 = vpack.c.bf16 (!%p195_p10), %v299_v15, %v299_v15  ;;  %v458_v20 = vsub.s32 (!%p195_p10), 0, %v457_v19  ;;  %v462_v22 = vsub.s32 (!%p195_p10), 1, %v457_v19  ;;  %s950_s11 = scalar_lea.hbm (!%p195_p10), %s1007_s3, %s653_s7  ;;  %s958_s15 = scalar_lea.sflag (!%p195_p10), [#allocation4], %s231_s5 }
  0x13   : > { %s799_s19 = smov (!%p195_p10), [#allocation3]  }
  0x14   : > { %s721_s21 = sshll.u32 (!%p195_p10), %s799_s19, 4  ;;  %s722_s21 = int_to_ptr.vmem [resolvable:$false] %s721_s21 }
  0x15   : > { %s723_s23 = scalar_lea.vmem (!%p195_p10), %s722_s21, 3584 }
  0x16   : > { %s1018_s26 = smov (!%p246_p11, %s640_s26), 3  ;;  %v291_v45 = vld [vmem:[#allocation2 + $0x60] sm:$0x1]  ;;  %v292_v48 = vld [vmem:[#allocation2 + $0x68] sm:$0x1] }
  0x17   : > { %s641_s27 = sshll.u32 %s1018_s26, 1  ;;  %s256_s4 = scalar_lea.vmem %s1006_s2, %s1018_s26 }
  0x18   : > { %s251_s30 = scalar_lea.vmem %s1005_s1, %s641_s27  ;;  %v454_v21 = vld [vmem:[%s256_s4] sm:$0x3]  ;;  %s925_s26 = scalar_lea.vmem [#allocation3], %s656_s6 }
  0x19   : > { %v643_v2 = vld.sshfl [vmem:[%s251_s30] sm:$0x33 pattern:$0x76325410]  ;;  %v911_v23 = vrot.slane %v454_v21, %v458_v20  ;;  %v913_v24 = vrot.slane %v454_v21, %v462_v22  ;;  %s525_s8 = sshll.u32 %s925_s26, 4  ;;  %s952_s8 = int_to_ptr.vmem [resolvable:$true] %s525_s8 }
  0x1a   : > { %v313_v3 = vcombine.high %v643_v2, %v643_v2  ;;  %v316_v4 = vpack.c.bf16 %v643_v2, %v643_v2  ;;  %s717_s18 = scalar_lea.vmem %s952_s8, 1792  ;;  %p724_p1 = scmp.lt.s32.totalorder %s952_s8, %s722_s21 }
  0x1b   : > { %p718_p12 = scmp.ne.s32.totalorder %s952_s8, %s717_s18  ;;  %p725_p2 = scmp.lt.s32.totalorder %s723_s23, %s717_s18 }
  0x1c   : > { %v317_v9 = vpack.c.bf16 %v313_v3, %v313_v3  ;;  %v333_v10 = vsel %vm331_vm0, %v316_v4, 0 }
  0x1d   : > { %p719_p13 = pnand %p718_p12, %p863_p4  ;;  %p726_p3 = por %p725_p2, %p724_p1 }
  0x1e   : > { %644 = vmatprep.subr.msk.bf16.mxu0 %vm331_vm0, %v317_v9  ;;  %654 = vmatprep.subr.msk.bf16.mxu1 %vm331_vm0, %v317_v9 }
  0x1f   : > { %339 = vmatpush1.bf16.msra.mxu0 %v333_v10  ;;  %655 = vmatpush1.bf16.msra.mxu1 %v333_v10  ;;  %p720_p0 = pneg %p719_p13 }
  0x21   : > { %p727_p5 = pnand %p726_p3, %p720_p0 }
  0x22   : > { %645 = vmatmul.mubr.msk.bf16.vlgmr.msra.gmra.mrb[0].mxu0 %vm318_vm1, %v301_v11  ;;  %647 = vmatmul.mubr.msk.bf16.vlgmr.msra.gmra.mrb[0].mxu1 %vm318_vm1, %v303_v12 }
  0x23   : > { %380 = vmatprep.mubr.bf16.mxu0 %v797_v0  ;;  %400 = vmatprep.mubr.bf16.mxu1 %v797_v0 }
  0x2a   : > { %646 = vmatmul.mubr.msk.bf16.gmra.mrb[4].mxu0 %vm318_vm1, %v302_v16  ;;  %648 = vmatmul.mubr.msk.bf16.gmra.mrb[4].mxu1 %vm318_vm1, %v304_v17 }
  0xf5   : > { %v372_v25 = vpop.f32.mrb[0].mxu0  ;;  %v392_v26 = vpop.f32.mrb[0].mxu1 }
  0xf6   : > { %v374_v27 = vpop.f32.mrb[1].mxu0  ;;  %v394_v28 = vpop.f32.mrb[1].mxu1  ;;  %v466_v31 = vadd.f32 %v911_v23, %v372_v25  ;;  %v474_v32 = vadd.f32 %v911_v23, %v392_v26 }
  0xf7   : > { %v376_v29 = vpop.f32.mrb[2].mxu0  ;;  %v396_v30 = vpop.f32.mrb[2].mxu1  ;;  %v467_v35 = vadd.f32 %v913_v24, %v374_v27  ;;  %v475_v36 = vadd.f32 %v913_v24, %v394_v28 }
  0xf8   : > { %v378_v33 = vpop.f32.mrb[3].mxu0  ;;  %v398_v34 = vpop.f32.mrb[3].mxu1  ;;  %v480_v37 = vmax.f32 %v466_v31, 0.0  ;;  %v488_v38 = vmax.f32 %v474_v32, 0.0  ;;  %v468_v39 = vadd.f32 %v911_v23, %v376_v29  ;;  %v476_v40 = vadd.f32 %v911_v23, %v396_v30 }
  0xf9   : > { %v481_v41 = vmax.f32 %v467_v35, 0.0  ;;  %v489_v42 = vmax.f32 %v475_v36, 0.0  ;;  %v469_v43 = vadd.f32 %v913_v24, %v378_v33  ;;  %v477_v44 = vadd.f32 %v913_v24, %v398_v34 }
  0xfa   : > { %494 = vst [vmem:[%s925_s26] sm:$0xff] %v480_v37  ;;  %502 = vst [vmem:[%s925_s26 + $0x40] sm:$0xff] %v488_v38  ;;  %v482_v46 = vmax.f32 %v468_v39, 0.0  ;;  %v490_v47 = vmax.f32 %v476_v40, 0.0 }
  0xfb   : > { %495 = vst [vmem:[%s925_s26 + $0x8] sm:$0xff] %v481_v41  ;;  %503 = vst [vmem:[%s925_s26 + $0x48] sm:$0xff] %v489_v42  ;;  %v483_v49 = vmax.f32 %v469_v43, 0.0  ;;  %v491_v50 = vmax.f32 %v477_v44, 0.0 }
  0xfc   : > { %496 = vst [vmem:[%s925_s26 + $0x10] sm:$0xff] %v482_v46  ;;  %504 = vst [vmem:[%s925_s26 + $0x50] sm:$0xff] %v490_v47 }
  0xfd   : > { %v382_v51 = vpop.f32.mrb[4].mxu0  ;;  %v402_v52 = vpop.f32.mrb[4].mxu1  ;;  %497 = vst [vmem:[%s925_s26 + $0x18] sm:$0xff] %v483_v49  ;;  %505 = vst [vmem:[%s925_s26 + $0x58] sm:$0xff] %v491_v50 }
  0xfe   : > { %v421_v53 = vadd.f32 %v402_v52, %v291_v45  ;;  %v384_v54 = vpop.f32.mrb[5].mxu0  ;;  %v404_v55 = vpop.f32.mrb[5].mxu1  ;;  %v470_v59 = vadd.f32 %v911_v23, %v382_v51 }
  0xff   : > { %v422_v56 = vadd.f32 %v404_v55, %v292_v48  ;;  %v386_v57 = vpop.f32.mrb[6].mxu0  ;;  %v406_v58 = vpop.f32.mrb[6].mxu1  ;;  %v471_v62 = vadd.f32 %v913_v24, %v384_v54 }
 0x100   : > { %435 = vst [vmem:[#allocation2 + $0x60] sm:$0x1] %v421_v53  ;;  %v388_v60 = vpop.f32.mrb[7].mxu0  ;;  %v407_v61 = vpop.f32.mrb[7].mxu1  ;;  %v484_v63 = vmax.f32 %v470_v59, 0.0  ;;  %v472_v0 = vadd.f32 %v911_v23, %v386_v57 }
 0x101   : > { %436 = vst [vmem:[#allocation2 + $0x68] sm:$0x1] %v422_v56  ;;  %v485_v1 = vmax.f32 %v471_v62, 0.0  ;;  %v473_v2 = vadd.f32 %v913_v24, %v388_v60 }
 0x102   : > { %498 = vst [vmem:[%s925_s26 + $0x20] sm:$0xff] %v484_v63  ;;  %v486_v3 = vmax.f32 %v472_v0, 0.0 }
 0x103   : > { %499 = vst [vmem:[%s925_s26 + $0x28] sm:$0xff] %v485_v1  ;;  %v487_v4 = vmax.f32 %v473_v2, 0.0 }
 0x104   : > { %500 = vst [vmem:[%s925_s26 + $0x30] sm:$0xff] %v486_v3 }
 0x105   : > { %501 = vst [vmem:[%s925_s26 + $0x38] sm:$0xff] %v487_v4 }
 0x107   : > { %v452_v5 = vld [vmem:[#allocation2 + $0x60] sm:$0x1] }
 0x108   : > { %v478_v6 = vadd.f32 %v911_v23, %v452_v5  ;;  %v453_v7 = vld [vmem:[#allocation2 + $0x68] sm:$0x1] }
 0x109   : > { %v479_v8 = vadd.f32 %v913_v24, %v453_v7 }
 0x10a   : > { %v492_v9 = vmax.f32 %v478_v6, 0.0 }
 0x10b   : > { %v493_v10 = vmax.f32 %v479_v8, 0.0 }
 0x10c   : > { %506 = vst [vmem:[%s925_s26 + $0x60] sm:$0x1] %v492_v9 }
 0x10d   : > { %507 = vst [vmem:[%s925_s26 + $0x68] sm:$0x1] %v493_v10 }
 0x10e   : > { %730 = shalt.err (!%p727_p5)
}
 0x10f   : > { %s731_s27 = scalar_lea.hbm %s950_s11, 1792  ;;  %s735_s30 = scalar_lea.hbm %s1007_s3, 3584 }
 0x110   : > { %p732_p6 = scmp.ne.s32.totalorder %s950_s11, %s731_s27  ;;  %p736_p10 = scmp.lt.u32.totalorder %s950_s11, %s1007_s3 }
 0x111   : > { %p737_p11 = scmp.lt.u32.totalorder %s735_s30, %s731_s27  ;;  %p739_p13 = scmp.lt.u32.totalorder %s731_s27, %s950_s11 }
 0x112   : > { %p733_p7 = pnand %p732_p6, %p863_p4 }
 0x113   : > { %p738_p12 = por %p737_p11, %p736_p10 }
 0x114   : > { %p734_p9 = pneg %p733_p7 }
 0x115   : > { %p740_p0 = por %p739_p13, %p738_p12 }
 0x117   : > { %p741_p1 = pnand %p740_p0, %p734_p9 }
 0x119   : > { %744 = shalt.err (!%p741_p1)
}
 0x11a   : > { %s800_s6 = smov 256   ;;  %s801_s26 = smov 512  }
 0x11b   : > { %s802_s7 = smov 16  }
 0x11c   : > { %657 = dma.vmem_to_hbm [thread:$0]  (%p863_p4), %s952_s8, 1792, %s950_s11, %s958_s15, %s800_s6, %s801_s26, %s802_s7  }
 0x11d PF: > { %p663_p2 = scmp.ge.s32.totalorder %s795_s17, 2  ;;  %s540_s9 = sand.u32 1, %s775_s12  }
 0x11e   : > { %s541_s10 = scalar_lea.sflag [#allocation4], %s540_s9 }
 0x11f   : > { %p660_p3 = pnand %p663_p2, %p870_p8 }
 0x121   : > { %770 = dma.done.wait (!%p660_p3), %s541_s10, 1792  }
 0x122   : > { %772 = vsyncadd (!%p660_p3), %s541_s10, 4294965504  ;;  %s16_s17 = sadd.s32 1, %s795_s17   ;;  %s1010_s12 = smov %s779_s13 }
 0x123   : > { %p13_p5 = scmp.ge.s32.totalorder %s16_s17, 4   ;;  %s1011_s13 = smov %s783_s14 }
 0x124   : > { %s1012_s14 = smov %s876_s25  ;;  %s1013_s15 = smov %s791_s16 }
 0x125   : > { %s1014_s16 = smov %s1016_s20  ;;  %15 = sbr.rel (!%p13_p5) target bundleno = 4 (0x4), region = 81 }
 0x12c   :  { %546 = vsyncpa [#allocation4], 1 }
 0x12d   :  { %548 = vsyncpa [#allocation4 + $0x1], 1 }

</bundles_post_ra>
